<compile_context>
chip_gen: v7x
topology: tpu7x:2x2x1
jax: 0.10.0
libtpu: 0.0.40
codegen_flags: <defaults>
</compile_context>

<pallas_src>
import functools

import jax
import jax.numpy as jnp
from jax.experimental import pallas as pl
from jax.experimental.pallas import tpu as pltpu


# ----------------------------------------------------------------------------
# Pallas kernel: one (batch element, layer) pair per grid step.
# ----------------------------------------------------------------------------
def _encoder_kernel(x_ref, wqkv_ref, wo_ref, w1_ref, b1_ref, w2_ref, par_ref,
                    o_ref, x_scr, *, head_num, head_dim, dk_scale, eps, t_valid):
    l = pl.program_id(1)
    H, D = head_num, head_dim
    E = H * D

    # Load the input activation once per batch element (l == 0); afterwards the
    # activation is carried layer-to-layer in VMEM scratch.
    @pl.when(l == 0)
    def _():
        x_scr[...] = x_ref[0].astype(jnp.float32)

    x = x_scr[...]                                            # (Tp, E) f32
    Tp = x.shape[0]

    # ---- Multi-head attention ----------------------------------------------
    # Fused QKV projection (qkv_layer has no bias).  wqkv columns are ordered
    # (k, h, d), so one (Tp, 3H, D) -> (3H, Tp, D) relayout yields all heads in
    # batch-major form (single relayout instead of three big transposes).
    qkv = jnp.dot(x, wqkv_ref[0], preferred_element_type=jnp.float32)  # (Tp,3E)
    qkv = jnp.transpose(qkv.reshape(Tp, 3 * H, D), (1, 0, 2))          # (3H,Tp,D)
    q = qkv[0:H]
    k = qkv[H:2 * H]
    v = qkv[2 * H:3 * H]

    # NOTE: the PyTorch module MULTIPLIES by dk = sqrt(head_dim) (not divide).
    scores = jnp.einsum('htd,hsd->hts', q, k,
                        preferred_element_type=jnp.float32) * dk_scale  # (H,Tp,Tp)
    if Tp > t_valid:   # static (trace-time): mask padded key columns
        key_idx = jax.lax.broadcasted_iota(jnp.int32, scores.shape, 2)
        scores = jnp.where(key_idx >= t_valid, -1e30, scores)
    scores = scores - jnp.max(scores, axis=-1, keepdims=True)           # f32 softmax
    p = jnp.exp(scores)
    attn = p / jnp.sum(p, axis=-1, keepdims=True)                       # exact divide

    ctx = jnp.einsum('hts,hsd->htd', attn, v,
                     preferred_element_type=jnp.float32)                # (H,Tp,D)
    ctx = jnp.transpose(ctx, (1, 0, 2)).reshape(Tp, E)                  # (Tp,E) cols=(h,d)
    attn_out = jnp.dot(ctx, wo_ref[0], preferred_element_type=jnp.float32)

    # Packed small params: rows = [ln1_w, ln1_b, b2, ln2_w, ln2_b].
    par = par_ref[0]                                                    # (5, E)
    ln1_w, ln1_b = par[0:1], par[1:2]
    b2 = par[2:3]
    ln2_w, ln2_b = par[3:4], par[4:5]

    def layer_norm(y, w, b):
        mu = jnp.mean(y, axis=-1, keepdims=True)
        var = jnp.mean((y - mu) ** 2, axis=-1, keepdims=True)
        return (y - mu) * jax.lax.rsqrt(var + eps) * w + b

    # ---- residual + LayerNorm1 (dropout = identity) -------------------------
    x = layer_norm(x + attn_out, ln1_w, ln1_b)

    # ---- MLP: Linear -> GELU(tanh -> EUP slot) -> Linear --------------------
    h1 = jnp.dot(x, w1_ref[0], preferred_element_type=jnp.float32) + b1_ref[0]
    h1 = jax.nn.gelu(h1, approximate=True)
    h2 = jnp.dot(h1, w2_ref[0], preferred_element_type=jnp.float32) + b2

    # ---- residual + LayerNorm2 ----------------------------------------------
    x = layer_norm(x + h2, ln2_w, ln2_b)

    x_scr[...] = x
    o_ref[0] = x.astype(o_ref.dtype)


# ----------------------------------------------------------------------------
# Wrapper: one pallas_call for the whole encoder stack.
# ----------------------------------------------------------------------------
def transformer_encoder_pallas(x, sp, *, head_num):
    """x: (B, T, E) float32.  sp: dict of layer-stacked kernel params."""
    B, T, E = x.shape
    L = sp["wqkv"].shape[0]
    head_dim = E // head_num
    mlp_dim = sp["w1"].shape[2]
    dk_scale = float(head_dim ** 0.5)

    # Pad tokens to a sublane multiple (use 128 at production T); padded key
    # columns are masked inside the kernel, padded rows are sliced off.
    Tp = ((T + 7) // 8) * 8
    if Tp != T:
        x = jnp.pad(x, ((0, 0), (0, Tp - T), (0, 0)))

    kernel = functools.partial(_encoder_kernel, head_num=head_num,
                               head_dim=head_dim, dk_scale=dk_scale,
                               eps=1e-5, t_valid=T)

    def wspec(shape):
        # Layer-indexed weight block: streamed (and prefetched) along the L axis.
        return pl.BlockSpec(shape, lambda b, l: (l, 0, 0))

    out = pl.pallas_call(
        kernel,
        out_shape=jax.ShapeDtypeStruct((B, Tp, E), x.dtype),
        grid_spec=pltpu.PrefetchScalarGridSpec(
            num_scalar_prefetch=0,
            grid=(B, L),                                    # L innermost
            in_specs=[
                pl.BlockSpec((1, Tp, E), lambda b, l: (b, 0, 0)),   # x (per batch)
                wspec((1, E, 3 * E)),                               # fused Wqkv
                wspec((1, E, E)),                                   # Wo
                wspec((1, E, mlp_dim)),                             # W1
                wspec((1, 1, mlp_dim)),                             # b1
                wspec((1, mlp_dim, E)),                             # W2
                wspec((1, 5, E)),                                   # packed LN/bias params
            ],
            out_specs=pl.BlockSpec((1, Tp, E), lambda b, l: (b, 0, 0)),
            scratch_shapes=[pltpu.VMEM((Tp, E), jnp.float32)],      # layer-carried act
        ),
        compiler_params=pltpu.CompilerParams(
            dimension_semantics=("parallel", "arbitrary"),
            # Below v7x's 64 MiB physical VMEM; raise (~96-110 MiB) on v5e/v6e.
            vmem_limit_bytes=48 * 1024 * 1024,
        ),
    )(x, sp["wqkv"], sp["wo"], sp["w1"], sp["b1"], sp["w2"], sp["params"])

    return out[:, :T, :] if Tp != T else out


# ----------------------------------------------------------------------------
# Parameter init (PyTorch layout) + conversion glue to kernel layout.
# ----------------------------------------------------------------------------
def init_block_params_torch(key, embedding_dim, mlp_dim):
    """Deterministic init in PyTorch weight layout (out_features, in_features)."""
    ks = jax.random.split(key, 6)
    E, M = embedding_dim, mlp_dim
    s = 0.02
    return dict(
        Wqkv=jax.random.normal(ks[0], (3 * E, E), jnp.float32) * s,   # qkv_layer (no bias)
        Wout=jax.random.normal(ks[1], (E, E), jnp.float32) * s,       # out_attention (no bias)
        W1=jax.random.normal(ks[2], (M, E), jnp.float32) * s,
        b1=jax.random.normal(ks[3], (M,), jnp.float32) * s,
        W2=jax.random.normal(ks[4], (E, M), jnp.float32) * s,
        b2=jax.random.normal(ks[5], (E,), jnp.float32) * s,
        ln1_w=jnp.ones((E,), jnp.float32), ln1_b=jnp.zeros((E,), jnp.float32),
        ln2_w=jnp.ones((E,), jnp.float32), ln2_b=jnp.zeros((E,), jnp.float32),
    )


def to_kernel_params(tp, embedding_dim, head_num):
    """Glue: per the rearrange 'b t (d k h) -> k b h t d', re-order the qkv weight
    so the fused (E, 3E) matrix has columns ordered (k, h, d); pre-transpose all
    weights for plain x @ W matmuls; pack small per-row params into one (5, E)."""
    E = embedding_dim
    hd = E // head_num
    WqkvT = tp["Wqkv"].T.reshape(E, hd, 3, head_num)          # [in, d, k, h]
    wqkv = jnp.transpose(WqkvT, (0, 2, 3, 1)).reshape(E, 3 * E)   # cols (k, h, d)
    params = jnp.stack([tp["ln1_w"], tp["ln1_b"], tp["b2"],
                        tp["ln2_w"], tp["ln2_b"]], axis=0)        # (5, E)
    return dict(
        wqkv=wqkv,
        wo=tp["Wout"].T,                                      # input already (h d) ordered
        w1=tp["W1"].T,
        b1=tp["b1"].reshape(1, -1),
        w2=tp["W2"].T,
        params=params,
    )


def stack_layer_params(per_layer):
    """Stack per-layer kernel params along a leading layer axis."""
    return {k: jnp.stack([p[k] for p in per_layer], axis=0) for k in per_layer[0]}


# ----------------------------------------------------------------------------
# Pure-JAX reference (mirrors the PyTorch forward exactly, f32), for verification.
# ----------------------------------------------------------------------------
def _layer_norm_ref(x, w, b, eps=1e-5):
    mu = jnp.mean(x, axis=-1, keepdims=True)
    var = jnp.mean((x - mu) ** 2, axis=-1, keepdims=True)
    return (x - mu) / jnp.sqrt(var + eps) * w + b


def encoder_block_ref(x, tp, head_num):
    B, T, E = x.shape
    hd = E // head_num
    qkv = x @ tp["Wqkv"].T                                    # (B, T, 3E)
    qkv = qkv.reshape(B, T, hd, 3, head_num)                  # b t (d k h)
    qkv = jnp.transpose(qkv, (3, 0, 4, 1, 2))                 # k b h t d
    q, k, v = qkv[0], qkv[1], qkv[2]
    energy = jnp.einsum('bhid,bhjd->bhij', q, k) * (hd ** 0.5)
    attn = jax.nn.softmax(energy, axis=-1)
    o = jnp.einsum('bhij,bhjd->bhid', attn, v)
    o = jnp.transpose(o, (0, 2, 1, 3)).reshape(B, T, E)       # b t (h d)
    o = o @ tp["Wout"].T
    x = _layer_norm_ref(x + o, tp["ln1_w"], tp["ln1_b"])
    h = jax.nn.gelu(x @ tp["W1"].T + tp["b1"], approximate=False)
    h = h @ tp["W2"].T + tp["b2"]
    x = _layer_norm_ref(x + h, tp["ln2_w"], tp["ln2_b"])
    return x


# ----------------------------------------------------------------------------
if __name__ == "__main__":
    B, T, E = 2, 8, 32
    head_num, mlp_dim, block_num = 4, 64, 3

    key = jax.random.PRNGKey(0)
    kx, kp = jax.random.split(key)
    x = jax.random.normal(kx, (B, T, E), jnp.float32)

    block_keys = jax.random.split(kp, block_num)
    torch_params = [init_block_params_torch(bk, E, mlp_dim) for bk in block_keys]
    kernel_params = stack_layer_params(
        [to_kernel_params(tp, E, head_num) for tp in torch_params])

    out = transformer_encoder_pallas(x, kernel_params, head_num=head_num)
    out = jax.block_until_ready(out)

    # Verify against a pure-JAX f32 reference of the PyTorch forward.
    # (Only approximation in the kernel is tanh-GELU vs exact erf.)
    ref = x
    for tp in torch_params:
        ref = encoder_block_ref(ref, tp, head_num)
    assert out.shape == (B, T, E)
    assert jnp.allclose(out, ref, rtol=5e-3, atol=5e-3), "mismatch vs reference"

    print("KERNEL_OK")
</pallas_src>

<mosaic_0001>
module attributes {stable_mosaic.version = 11 : i64} {
  func.func @_encoder_kernel(%arg0: i32, %arg1: i32, %arg2: memref<1x8x32xf32, #tpu.memory_space<vmem>>, %arg3: memref<1x32x96xf32, #tpu.memory_space<vmem>>, %arg4: memref<1x32x32xf32, #tpu.memory_space<vmem>>, %arg5: memref<1x32x64xf32, #tpu.memory_space<vmem>>, %arg6: memref<1x1x64xf32, #tpu.memory_space<vmem>>, %arg7: memref<1x64x32xf32, #tpu.memory_space<vmem>>, %arg8: memref<1x5x32xf32, #tpu.memory_space<vmem>>, %arg9: memref<1x8x32xf32, #tpu.memory_space<vmem>>, %arg10: memref<8x32xf32, #tpu.memory_space<vmem>>) attributes {dimension_semantics = [#tpu.dimension_semantics<parallel>, #tpu.dimension_semantics<arbitrary>], iteration_bounds = array<i64: 2, 3>, scalar_prefetch = 0 : i64, scratch_operands = 1 : i64, tpu.core_type = #tpu.core_type<tc>, window_params = [{transform_indices = @transform_0, window_bounds = array<i64: 1, 8, 32>}, {transform_indices = @transform_1, window_bounds = array<i64: 1, 32, 96>}, {transform_indices = @transform_2, window_bounds = array<i64: 1, 32, 32>}, {transform_indices = @transform_3, window_bounds = array<i64: 1, 32, 64>}, {transform_indices = @transform_4, window_bounds = array<i64: 1, 1, 64>}, {transform_indices = @transform_5, window_bounds = array<i64: 1, 64, 32>}, {transform_indices = @transform_6, window_bounds = array<i64: 1, 5, 32>}, {transform_indices = @transform_7, window_bounds = array<i64: 1, 8, 32>}]} {
    %c0_i32 = arith.constant 0 : i32
    %0 = arith.cmpi eq, %arg1, %c0_i32 : i32
    %1 = arith.extui %0 : i1 to i32
    %c0_i32_0 = arith.constant 0 : i32
    %2 = arith.cmpi ne, %1, %c0_i32_0 : i32
    scf.if %2 {
      %c0_47 = arith.constant 0 : index
      %c0_48 = arith.constant 0 : index
      %c0_49 = arith.constant 0 : index
      %112 = vector.load %arg2[%c0_47, %c0_48, %c0_49] : memref<1x8x32xf32, #tpu.memory_space<vmem>>, vector<1x8x32xf32>
      %113 = vector.shape_cast %112 : vector<1x8x32xf32> to vector<8x32xf32>
      %c0_50 = arith.constant 0 : index
      %c0_51 = arith.constant 0 : index
      %114 = vector.load %arg10[%c0_50, %c0_51] : memref<8x32xf32, #tpu.memory_space<vmem>>, vector<8x32xf32>
      tpu.vector_store %arg10[%c0_50, %c0_51], %113 {strides = array<i32>} : memref<8x32xf32, #tpu.memory_space<vmem>>, vector<8x32xf32>,
    } else {
    }
    %c0 = arith.constant 0 : index
    %c0_1 = arith.constant 0 : index
    %3 = vector.load %arg10[%c0, %c0_1] : memref<8x32xf32, #tpu.memory_space<vmem>>, vector<8x32xf32>
    %c0_2 = arith.constant 0 : index
    %c0_3 = arith.constant 0 : index
    %c0_4 = arith.constant 0 : index
    %4 = vector.load %arg3[%c0_2, %c0_3, %c0_4] : memref<1x32x96xf32, #tpu.memory_space<vmem>>, vector<1x32x96xf32>
    %5 = vector.shape_cast %4 : vector<1x32x96xf32> to vector<32x96xf32>
    %cst = arith.constant dense<0.000000e+00> : vector<8x96xf32>
    %6 = tpu.matmul %3, %5, %cst {dimension_numbers = #tpu.dot_dimension_numbers<[1], [0], [0], [1], [0, 0, 1, 1], [], []>} : vector<8x32xf32>, vector<32x96xf32>, vector<8x96xf32> -> vector<8x96xf32>
    %7 = vector.shape_cast %6 : vector<8x96xf32> to vector<8x12x8xf32>
    %8 = tpu.transpose %7, [1, 0, 2] : vector<8x12x8xf32> -> vector<12x8x8xf32>
    %9 = vector.extract_strided_slice %8 {offsets = [0, 0, 0], sizes = [4, 8, 8], strides = [1, 1, 1]} : vector<12x8x8xf32> to vector<4x8x8xf32>
    %10 = vector.extract_strided_slice %8 {offsets = [4, 0, 0], sizes = [4, 8, 8], strides = [1, 1, 1]} : vector<12x8x8xf32> to vector<4x8x8xf32>
    %11 = vector.extract_strided_slice %8 {offsets = [8, 0, 0], sizes = [4, 8, 8], strides = [1, 1, 1]} : vector<12x8x8xf32> to vector<4x8x8xf32>
    "tpu.trace_start"() <{level = 10 : i32, message = "htd,hsd->hts"}> : () -> ()
    %cst_5 = arith.constant dense<0.000000e+00> : vector<4x8x8xf32>
    %12 = tpu.matmul %9, %10, %cst_5 {dimension_numbers = #tpu.dot_dimension_numbers<[2], [2], [1], [1], [0, 0, 0, 1, 1, 1], [0], [0]>} : vector<4x8x8xf32>, vector<4x8x8xf32>, vector<4x8x8xf32> -> vector<4x8x8xf32>
    "tpu.trace_stop"() : () -> ()
    %cst_6 = arith.constant 2.82842708 : f32
    %13 = vector.broadcast %cst_6 : f32 to vector<4x8x8xf32>
    %14 = arith.mulf %12, %13 : vector<4x8x8xf32>
    %cst_7 = arith.constant dense<0xFF800000> : vector<4x8xf32>
    %15 = vector.multi_reduction <maximumf>, %14, %cst_7 [2] : vector<4x8x8xf32> to vector<4x8xf32>
    %16 = vector.shape_cast %15 : vector<4x8xf32> to vector<4x8x1xf32>
    %17 = vector.broadcast %16 : vector<4x8x1xf32> to vector<4x8x8xf32>
    %18 = arith.subf %14, %17 : vector<4x8x8xf32>
    %19 = math.exp %18 : vector<4x8x8xf32>
    %cst_8 = arith.constant dense<0.000000e+00> : vector<4x8xf32>
    %20 = vector.multi_reduction <add>, %19, %cst_8 [2] : vector<4x8x8xf32> to vector<4x8xf32>
    %21 = vector.shape_cast %20 : vector<4x8xf32> to vector<4x8x1xf32>
    %22 = vector.broadcast %21 : vector<4x8x1xf32> to vector<4x8x8xf32>
    %23 = arith.divf %19, %22 : vector<4x8x8xf32>
    "tpu.trace_start"() <{level = 10 : i32, message = "hts,hsd->htd"}> : () -> ()
    %cst_9 = arith.constant dense<0.000000e+00> : vector<4x8x8xf32>
    %24 = tpu.matmul %23, %11, %cst_9 {dimension_numbers = #tpu.dot_dimension_numbers<[2], [1], [1], [2], [0, 0, 0, 1, 1, 2], [0], [0]>} : vector<4x8x8xf32>, vector<4x8x8xf32>, vector<4x8x8xf32> -> vector<4x8x8xf32>
    "tpu.trace_stop"() : () -> ()
    %25 = tpu.transpose %24, [1, 0, 2] : vector<4x8x8xf32> -> vector<8x4x8xf32>
    %26 = vector.shape_cast %25 : vector<8x4x8xf32> to vector<8x32xf32>
    %c0_10 = arith.constant 0 : index
    %c0_11 = arith.constant 0 : index
    %c0_12 = arith.constant 0 : index
    %27 = vector.load %arg4[%c0_10, %c0_11, %c0_12] : memref<1x32x32xf32, #tpu.memory_space<vmem>>, vector<1x32x32xf32>
    %28 = vector.shape_cast %27 : vector<1x32x32xf32> to vector<32x32xf32>
    %cst_13 = arith.constant dense<0.000000e+00> : vector<8x32xf32>
    %29 = tpu.matmul %26, %28, %cst_13 {dimension_numbers = #tpu.dot_dimension_numbers<[1], [0], [0], [1], [0, 0, 1, 1], [], []>} : vector<8x32xf32>, vector<32x32xf32>, vector<8x32xf32> -> vector<8x32xf32>
    %c0_14 = arith.constant 0 : index
    %c0_15 = arith.constant 0 : index
    %c0_16 = arith.constant 0 : index
    %30 = vector.load %arg8[%c0_14, %c0_15, %c0_16] : memref<1x5x32xf32, #tpu.memory_space<vmem>>, vector<1x5x32xf32>
    %31 = vector.shape_cast %30 : vector<1x5x32xf32> to vector<5x32xf32>
    %32 = vector.extract_strided_slice %31 {offsets = [0, 0], sizes = [1, 32], strides = [1, 1]} : vector<5x32xf32> to vector<1x32xf32>
    %33 = vector.extract_strided_slice %31 {offsets = [1, 0], sizes = [1, 32], strides = [1, 1]} : vector<5x32xf32> to vector<1x32xf32>
    %34 = vector.extract_strided_slice %31 {offsets = [2, 0], sizes = [1, 32], strides = [1, 1]} : vector<5x32xf32> to vector<1x32xf32>
    %35 = vector.extract_strided_slice %31 {offsets = [3, 0], sizes = [1, 32], strides = [1, 1]} : vector<5x32xf32> to vector<1x32xf32>
    %36 = vector.extract_strided_slice %31 {offsets = [4, 0], sizes = [1, 32], strides = [1, 1]} : vector<5x32xf32> to vector<1x32xf32>
    %37 = arith.addf %3, %29 : vector<8x32xf32>
    %cst_17 = arith.constant dense<0.000000e+00> : vector<8xf32>
    %38 = vector.multi_reduction <add>, %37, %cst_17 [1] : vector<8x32xf32> to vector<8xf32>
    %39 = vector.shape_cast %38 : vector<8xf32> to vector<8x1xf32>
    %cst_18 = arith.constant 3.200000e+01 : f32
    %40 = vector.broadcast %cst_18 : f32 to vector<8x1xf32>
    %41 = arith.divf %39, %40 : vector<8x1xf32>
    %42 = vector.broadcast %41 : vector<8x1xf32> to vector<8x32xf32>
    %43 = arith.subf %37, %42 : vector<8x32xf32>
    %44 = arith.mulf %43, %43 : vector<8x32xf32>
    %cst_19 = arith.constant dense<0.000000e+00> : vector<8xf32>
    %45 = vector.multi_reduction <add>, %44, %cst_19 [1] : vector<8x32xf32> to vector<8xf32>
    %46 = vector.shape_cast %45 : vector<8xf32> to vector<8x1xf32>
    %cst_20 = arith.constant 3.200000e+01 : f32
    %47 = vector.broadcast %cst_20 : f32 to vector<8x1xf32>
    %48 = arith.divf %46, %47 : vector<8x1xf32>
    %49 = vector.broadcast %41 : vector<8x1xf32> to vector<8x32xf32>
    %50 = arith.subf %37, %49 : vector<8x32xf32>
    %cst_21 = arith.constant 9.99999974E-6 : f32
    %51 = vector.broadcast %cst_21 : f32 to vector<8x1xf32>
    %52 = arith.addf %48, %51 : vector<8x1xf32>
    %53 = math.rsqrt %52 : vector<8x1xf32>
    %54 = vector.broadcast %53 : vector<8x1xf32> to vector<8x32xf32>
    %55 = arith.mulf %50, %54 : vector<8x32xf32>
    %56 = vector.broadcast %32 : vector<1x32xf32> to vector<8x32xf32>
    %57 = arith.mulf %55, %56 : vector<8x32xf32>
    %58 = vector.broadcast %33 : vector<1x32xf32> to vector<8x32xf32>
    %59 = arith.addf %57, %58 : vector<8x32xf32>
    %c0_22 = arith.constant 0 : index
    %c0_23 = arith.constant 0 : index
    %c0_24 = arith.constant 0 : index
    %60 = vector.load %arg5[%c0_22, %c0_23, %c0_24] : memref<1x32x64xf32, #tpu.memory_space<vmem>>, vector<1x32x64xf32>
    %61 = vector.shape_cast %60 : vector<1x32x64xf32> to vector<32x64xf32>
    %cst_25 = arith.constant dense<0.000000e+00> : vector<8x64xf32>
    %62 = tpu.matmul %59, %61, %cst_25 {dimension_numbers = #tpu.dot_dimension_numbers<[1], [0], [0], [1], [0, 0, 1, 1], [], []>} : vector<8x32xf32>, vector<32x64xf32>, vector<8x64xf32> -> vector<8x64xf32>
    %c0_26 = arith.constant 0 : index
    %c0_27 = arith.constant 0 : index
    %c0_28 = arith.constant 0 : index
    %63 = vector.load %arg6[%c0_26, %c0_27, %c0_28] : memref<1x1x64xf32, #tpu.memory_space<vmem>>, vector<1x1x64xf32>
    %64 = vector.shape_cast %63 : vector<1x1x64xf32> to vector<1x64xf32>
    %65 = vector.broadcast %64 : vector<1x64xf32> to vector<8x64xf32>
    %66 = arith.addf %62, %65 : vector<8x64xf32>
    %67 = arith.mulf %66, %66 : vector<8x64xf32>
    %68 = arith.mulf %66, %67 : vector<8x64xf32>
    %cst_29 = arith.constant 4.471500e-02 : f32
    %69 = vector.broadcast %cst_29 : f32 to vector<8x64xf32>
    %70 = arith.mulf %69, %68 : vector<8x64xf32>
    %71 = arith.addf %66, %70 : vector<8x64xf32>
    %cst_30 = arith.constant 0.797884583 : f32
    %72 = vector.broadcast %cst_30 : f32 to vector<8x64xf32>
    %73 = arith.mulf %72, %71 : vector<8x64xf32>
    %74 = math.tanh %73 : vector<8x64xf32>
    %cst_31 = arith.constant 1.000000e+00 : f32
    %75 = vector.broadcast %cst_31 : f32 to vector<8x64xf32>
    %76 = arith.addf %75, %74 : vector<8x64xf32>
    %cst_32 = arith.constant 5.000000e-01 : f32
    %77 = vector.broadcast %cst_32 : f32 to vector<8x64xf32>
    %78 = arith.mulf %77, %76 : vector<8x64xf32>
    %79 = arith.mulf %66, %78 : vector<8x64xf32>
    %c0_33 = arith.constant 0 : index
    %c0_34 = arith.constant 0 : index
    %c0_35 = arith.constant 0 : index
    %80 = vector.load %arg7[%c0_33, %c0_34, %c0_35] : memref<1x64x32xf32, #tpu.memory_space<vmem>>, vector<1x64x32xf32>
    %81 = vector.shape_cast %80 : vector<1x64x32xf32> to vector<64x32xf32>
    %cst_36 = arith.constant dense<0.000000e+00> : vector<8x32xf32>
    %82 = tpu.matmul %79, %81, %cst_36 {dimension_numbers = #tpu.dot_dimension_numbers<[1], [0], [0], [1], [0, 0, 1, 1], [], []>} : vector<8x64xf32>, vector<64x32xf32>, vector<8x32xf32> -> vector<8x32xf32>
    %83 = vector.broadcast %34 : vector<1x32xf32> to vector<8x32xf32>
    %84 = arith.addf %82, %83 : vector<8x32xf32>
    %85 = arith.addf %59, %84 : vector<8x32xf32>
    %cst_37 = arith.constant dense<0.000000e+00> : vector<8xf32>
    %86 = vector.multi_reduction <add>, %85, %cst_37 [1] : vector<8x32xf32> to vector<8xf32>
    %87 = vector.shape_cast %86 : vector<8xf32> to vector<8x1xf32>
    %cst_38 = arith.constant 3.200000e+01 : f32
    %88 = vector.broadcast %cst_38 : f32 to vector<8x1xf32>
    %89 = arith.divf %87, %88 : vector<8x1xf32>
    %90 = vector.broadcast %89 : vector<8x1xf32> to vector<8x32xf32>
    %91 = arith.subf %85, %90 : vector<8x32xf32>
    %92 = arith.mulf %91, %91 : vector<8x32xf32>
    %cst_39 = arith.constant dense<0.000000e+00> : vector<8xf32>
    %93 = vector.multi_reduction <add>, %92, %cst_39 [1] : vector<8x32xf32> to vector<8xf32>
    %94 = vector.shape_cast %93 : vector<8xf32> to vector<8x1xf32>
    %cst_40 = arith.constant 3.200000e+01 : f32
    %95 = vector.broadcast %cst_40 : f32 to vector<8x1xf32>
    %96 = arith.divf %94, %95 : vector<8x1xf32>
    %97 = vector.broadcast %89 : vector<8x1xf32> to vector<8x32xf32>
    %98 = arith.subf %85, %97 : vector<8x32xf32>
    %cst_41 = arith.constant 9.99999974E-6 : f32
    %99 = vector.broadcast %cst_41 : f32 to vector<8x1xf32>
    %100 = arith.addf %96, %99 : vector<8x1xf32>
    %101 = math.rsqrt %100 : vector<8x1xf32>
    %102 = vector.broadcast %101 : vector<8x1xf32> to vector<8x32xf32>
    %103 = arith.mulf %98, %102 : vector<8x32xf32>
    %104 = vector.broadcast %35 : vector<1x32xf32> to vector<8x32xf32>
    %105 = arith.mulf %103, %104 : vector<8x32xf32>
    %106 = vector.broadcast %36 : vector<1x32xf32> to vector<8x32xf32>
    %107 = arith.addf %105, %106 : vector<8x32xf32>
    %c0_42 = arith.constant 0 : index
    %c0_43 = arith.constant 0 : index
    %108 = vector.load %arg10[%c0_42, %c0_43] : memref<8x32xf32, #tpu.memory_space<vmem>>, vector<8x32xf32>
    tpu.vector_store %arg10[%c0_42, %c0_43], %107 {strides = array<i32>} : memref<8x32xf32, #tpu.memory_space<vmem>>, vector<8x32xf32>,
    %c0_44 = arith.constant 0 : index
    %c0_45 = arith.constant 0 : index
    %c0_46 = arith.constant 0 : index
    %109 = vector.load %arg9[%c0_44, %c0_45, %c0_46] : memref<1x8x32xf32, #tpu.memory_space<vmem>>, vector<1x8x32xf32>
    %110 = vector.shape_cast %109 : vector<1x8x32xf32> to vector<8x32xf32>
    %111 = vector.shape_cast %107 : vector<8x32xf32> to vector<1x8x32xf32>
    tpu.vector_store %arg9[%c0_44, %c0_45, %c0_46], %111 {strides = array<i32>} : memref<1x8x32xf32, #tpu.memory_space<vmem>>, vector<1x8x32xf32>,
    return
  }
  func.func @transform_0(%arg0: i32, %arg1: i32) -> (i32, i32, i32) {
    %c0_i32 = arith.constant 0 : i32
    %c0_i32_0 = arith.constant 0 : i32
    %c0_i32_1 = arith.constant 0 : i32
    return %arg0, %c0_i32, %c0_i32_0 : i32, i32, i32
  }
  func.func @transform_1(%arg0: i32, %arg1: i32) -> (i32, i32, i32) {
    %c0_i32 = arith.constant 0 : i32
    %c0_i32_0 = arith.constant 0 : i32
    %c0_i32_1 = arith.constant 0 : i32
    return %arg1, %c0_i32, %c0_i32_0 : i32, i32, i32
  }
  func.func @transform_2(%arg0: i32, %arg1: i32) -> (i32, i32, i32) {
    %c0_i32 = arith.constant 0 : i32
    %c0_i32_0 = arith.constant 0 : i32
    %c0_i32_1 = arith.constant 0 : i32
    return %arg1, %c0_i32, %c0_i32_0 : i32, i32, i32
  }
  func.func @transform_3(%arg0: i32, %arg1: i32) -> (i32, i32, i32) {
    %c0_i32 = arith.constant 0 : i32
    %c0_i32_0 = arith.constant 0 : i32
    %c0_i32_1 = arith.constant 0 : i32
    return %arg1, %c0_i32, %c0_i32_0 : i32, i32, i32
  }
  func.func @transform_4(%arg0: i32, %arg1: i32) -> (i32, i32, i32) {
    %c0_i32 = arith.constant 0 : i32
    %c0_i32_0 = arith.constant 0 : i32
    %c0_i32_1 = arith.constant 0 : i32
    return %arg1, %c0_i32, %c0_i32_0 : i32, i32, i32
  }
  func.func @transform_5(%arg0: i32, %arg1: i32) -> (i32, i32, i32) {
    %c0_i32 = arith.constant 0 : i32
    %c0_i32_0 = arith.constant 0 : i32
    %c0_i32_1 = arith.constant 0 : i32
    return %arg1, %c0_i32, %c0_i32_0 : i32, i32, i32
  }
  func.func @transform_6(%arg0: i32, %arg1: i32) -> (i32, i32, i32) {
    %c0_i32 = arith.constant 0 : i32
    %c0_i32_0 = arith.constant 0 : i32
    %c0_i32_1 = arith.constant 0 : i32
    return %arg1, %c0_i32, %c0_i32_0 : i32, i32, i32
  }
  func.func @transform_7(%arg0: i32, %arg1: i32) -> (i32, i32, i32) {
    %c0_i32 = arith.constant 0 : i32
    %c0_i32_0 = arith.constant 0 : i32
    %c0_i32_1 = arith.constant 0 : i32
    return %arg0, %c0_i32, %c0_i32_0 : i32, i32, i32
  }
}

</mosaic_0001>

<bundles_post_ra>
// kernel: tpu_custom_call.1
= control target key start
LH: loop header
LB: loop body
LE: loop exit
PB: predicated region body
PF: predicated region fallthrough
CT: control target
= control target key end

     0   :  { %s3059_s0 = inlined_call_operand.vmem [shape: f32[2,8,32], index: 0, kind: input, shape index: {}]   ;;  %s3060_s1 = inlined_call_operand.vmem [shape: f32[3,32,96], index: 1, kind: input, shape index: {}]   ;;  %s3061_s2 = inlined_call_operand.vmem [shape: f32[3,32,32], index: 2, kind: input, shape index: {}]   ;;  %s3062_s3 = inlined_call_operand.vmem [shape: f32[3,32,64], index: 3, kind: input, shape index: {}]   ;;  %s3063_s4 = inlined_call_operand.vmem [shape: f32[3,1,64], index: 4, kind: input, shape index: {}]   ;;  %s3064_s5 = inlined_call_operand.vmem [shape: f32[3,64,32], index: 5, kind: input, shape index: {}]   ;;  %s3065_s6 = inlined_call_operand.vmem [shape: f32[3,5,32], index: 6, kind: input, shape index: {}]   ;;  %s3066_s7 = inlined_call_operand.hbm [shape: f32[2,8,32], index: 7, kind: output, shape index: {}]  }
   0x1   :  { %3076 = sst [smem:[#allocation15_spill]] %s3059_s0 }
   0x2   :  { %3077 = sst [smem:[#allocation16_spill]] %s3060_s1 }
   0x3   :  { %12 = vsyncpa [#allocation4], 0 }
   0x4   :  { %14 = vsyncpa [#allocation4 + $0x1], 0  ;;  %s2668_s24 = smov 0   ;;  %s2670_s25 = smov 0  }
   0x5   :  { %s2672_s26 = smov 0   ;;  %s2674_s27 = smov 0  }
   0x6   :  { %s2676_s28 = smov 0   ;;  %s2678_s29 = smov 0  }
   0x7   :  { %s2680_s30 = smov 0   ;;  %s2682_s8 = smov 0  }
   0x8 LB: > { %3078 = sst [smem:[#allocation6_spill]] %s2578_s24  ;;  %s2184_s9 = sadd.s32 4294967295, %s2606_s8   ;;  %s2606_s8 = sphi %s2682_s8, %s20_s8   ;;  %s2602_s30 = sphi %s2680_s30, %s3103_s30   ;;  %s2598_s29 = sphi %s2678_s29, %s3099_s29   ;;  %s2594_s28 = sphi %s2676_s28, %s3098_s28   ;;  %s2590_s27 = sphi %s2674_s27, %s3097_s27   ;;  %s2586_s26 = sphi %s2672_s26, %s3096_s26   ;;  %s2582_s25 = sphi %s2670_s25, %s3102_s25   ;;  %s2578_s24 = sphi %s2668_s24, %s3101_s24  }
   0x9   : > { %3079 = sst [smem:[#allocation7_spill]] %s2586_s26  ;;  %s2185_s10 = sadd.s32 4294967294, %s2606_s8  }
   0xa   : > { %3080 = sst [smem:[#allocation8_spill]] %s2598_s29  ;;  %s29_s11 = sadd.s32 1, %s2598_s29 }
   0xb   : > { %3081 = sst [smem:[#allocation9_spill]] %s2602_s30  ;;  %p30_p0 = scmp.ge.s32.totalorder %s29_s11, 3 }
   0xc   : > { %3082 = sst [smem:[#allocation10_spill]] %s2606_s8  ;;  %s32_s12 = sadd.s32 1, %s2602_s30 }
   0xd   : > { %p231_p1 = scmp.ne.s32.totalorder %s2586_s26, %s2582_s25  ;;  %p232_p2 = scmp.eq.s32.totalorder %s2184_s9, 5 }
   0xe   : > { %s3105_s11 = smov (%p30_p0, %s29_s11), 0  ;;  %s3107_s12 = smov (!%p30_p0, %s32_s12), %s2602_s30 }
   0xf   : > { %3083 = sst [smem:[#allocation11_spill]] %s3105_s11  ;;  %p2717_p3 = por %p232_p2, %p231_p1 }
  0x10   : > { %p237_p4 = scmp.ne.s32.totalorder %s2582_s25, %s2578_s24  ;;  %p34_p5 = scmp.ge.s32.totalorder %s3107_s12, 2 }
  0x11   : > { %p238_p6 = scmp.eq.s32.totalorder %s2185_s10, 5  ;;  %p2188_p7 = scmp.ge.s32.totalorder %s2606_s8, 1 }
  0x12   : > { %p308_p8 = scmp.lt.s32.totalorder %s2606_s8, 7  ;;  %s3109_s12 = smov (%p34_p5, %s3107_s12), 0 }
  0x13   : > { %3085 = sst [smem:[#allocation12_spill]] %s3109_s12  ;;  %p2727_p9 = por %p238_p6, %p237_p4 }
  0x14   : > { %p309_p10 = pnand %p2188_p7, %p308_p8  ;;  %s218_s15 = ssub.s32 %s2602_s30, %s3109_s12 }
  0x15   : > { %s3086_s14 = scalar_select %p2727_p9, 1, 0 }
  0x16   : > { %s221_s16 = sadd.s32 1, %s2586_s26  ;;  %p219_p11 = scmp.eq.s32.totalorder %s218_s15, 0 }
  0x17   : > { %3087 = sst [smem:[#allocation13_spill]] %s3086_s14  ;;  %312 = sbr.rel (%p309_p10) target bundleno = 2619 (0xa3b), region = 48 }
  0x18   : > { %s2735_s17 = scalar_select %p219_p11, %s2586_s26, %s221_s16  }
  0x19   : > { %s3068_s18 = sand.u32 (!%p309_p10), 1, %s2582_s25   ;;  %p366_p12 = scmp.lt.s32.totalorder (!%p309_p10), %s2594_s28, 1 }
  0x1a   : > { %3088 = sst [smem:[#allocation14_spill]] %s2735_s17  ;;  %s2741_s19 = sshll.u32 (!%p309_p10), %s3068_s18, 3 }
  0x1b   : > { %p370_p13 = scmp.lt.s32.totalorder (!%p309_p10), %s2590_s27, 2  ;;  %s3089_s0 = sld [smem:[#allocation15_spill]] (!%p309_p10) }
  0x1c   : > { %s3090_s1 = sld [smem:[#allocation16_spill]] (!%p309_p10)  ;;  %p2200_p0 = scmp.ne.s32.totalorder (!%p309_p10), %s2590_s27, 0 }
  0x1e   : > { %s367_s20 = scalar_select %p366_p12, %s2594_s28, 1 }
  0x1f   : > { %s2746_s21 = scalar_select %p370_p13, %s2590_s27, 2 }
  0x20   : > { %s2190_s22 = sshll.u32 %s367_s20, 3  ;;  %400 = sbr.rel (%p2200_p0) target bundleno = 39 (0x27), region = 52  ;;  %vm402_vm0 = vcmask (!%p2200_p0), 261120  }
  0x21   : > { %s369_s10 = scalar_lea.vmem %s3089_s0, %s2190_s22  ;;  %s2234_s15 = sshll.u32 %s2746_s21, 5 }
  0x22   : > { %s374_s18 = scalar_lea.vmem %s3090_s1, %s2234_s15  ;;  %s2758_s29 = scalar_lea.vmem %s3061_s2, %s2234_s15  ;;  %v401_v0 = vld [vmem:[%s369_s10] sm:$0xff] (!%p2200_p0) }
  0x23   : > { %s2763_s14 = scalar_lea.vmem %s3062_s3, %s2234_s15  ;;  %s387_s23 = scalar_lea.vmem %s3063_s4, %s2746_s21  ;;  %403 = vst.msk [vmem:[#allocation2] sm:$0xff] (!%p2200_p0), %vm402_vm0, %v401_v0 }
  0x24   : > { %s2237_s22 = sshll.u32 %s2746_s21, 6  ;;  %s2199_s9 = sshll.u32 %s2746_s21, 3 }
  0x25   : > { %s2774_s12 = scalar_lea.vmem %s3064_s5, %s2237_s22  ;;  %s2779_s11 = scalar_lea.vmem %s3065_s6, %s2199_s9 }
  0x26   : > { %s365_s1 = scalar_lea.vmem [#allocation3], %s2741_s19 }
  0x27 PF: > { %v405_v1 = vld [vmem:[%s374_s18] sm:$0xff]  ;;  %v406_v2 = vld [vmem:[%s374_s18 + $0x8] sm:$0xff]  ;;  %v407_v3 = vld [vmem:[%s374_s18 + $0x10] sm:$0xff]  ;;  %v2608_v4 = vmov 0.0|0.0   ;;  %vm2609_vm1 = vmmov 0   ;;  %v2610_v7 = vmov 0.0   ;;  %v522_v14 = vlaneseq }
  0x28   : > { %2370 = vmatprep.subr.bf16.mxu1 %v2608_v4  ;;  %v2371_v5 = vpack.c.bf16 %v406_v2, %v405_v1  ;;  %v408_v6 = vld [vmem:[%s374_s18 + $0x18] sm:$0xff]  ;;  %2286 = vmatprep.mubr.msk.f32.mxu1 %vm2609_vm1, %v2610_v7  ;;  %vm409_vm2 = vcmask 261120   ;;  %s2611_s0 = smov 80   ;;  %s2612_s24 = smov 96   ;;  %v2618_v12 = vmov 1983009808  }
  0x29   : > { %2299 = vmatprep.subr.mxu0 %v2610_v7  ;;  %2301 = vmatprep.mubr.msk.f32.mxu0 %vm2609_vm1, %v2610_v7  ;;  %v2374_v8 = vpack.c.bf16 %v408_v6, %v407_v3  ;;  %s2613_s26 = smov 72   ;;  %s2614_s27 = smov 88   ;;  %v520_v13 = vunpack.c.l.s4 %v2618_v12  ;;  %v2619_v15 = vmov 1934713408   ;;  %v2806_v18 = vshrl.u32 %v522_v14, 7 }
  0x2a   : > { %2372 = vmatpush3.bf16.msra.mxu1 %v2371_v5  ;;  %v2790_v9 = vld [vmem:[#allocation2] sm:$0xff]  ;;  %s2615_s8 = smov 112   ;;  %s2616_s17 = smov 120   ;;  %v584_v16 = vunpack.c.l.s4 %v2619_v15  ;;  %vm925_vm3 = vcmask 64512   ;;  %vm1719_vm4 = vcmask 130048   ;;  %vm1721_vm5 = vcmask 195584  }
  0x2b   : > { %2373 = vmatprep.subr.bf16.mxu1 %v2608_v4  ;;  %s2617_s18 = smov 104   ;;  %v521_v17 = vunpack.c.0.s8 %v520_v13  ;;  %s2620_s10 = smov 56   ;;  %vm1931_vm6 = vcmask 523264  }
  0x2c   : > { %v585_v21 = vunpack.c.0.s8 %v584_v16  ;;  %s2621_s15 = smov 64   ;;  %s2622_s20 = smov 48  }
  0x2d   : > { %v2809_v22 = vsub.s32 %v521_v17, %v2806_v18  ;;  %s2623_s22 = smov 40   ;;  %s2625_s9 = smov 8  }
  0x2e   : > { %2375 = vmatpush3.bf16.msra.mxu1 %v2374_v8  ;;  %v2812_v29 = vsub.s32 %v585_v21, %v2806_v18  ;;  %s2626_s16 = smov 24   ;;  %s2231_s21 = sshll.u32 %s2594_s28, 7 }
  0x2f   : > { %2289 = vmatprep.subr.mxu1 %v2610_v7  ;;  %s3091_s28 = sand.u32 1, %s2582_s25  }
  0x31   : > { %2287 = vmatmul.mubr.msk.f32.vlgmr.msra.gmra.mrb[0].mxu1 %vm409_vm2, %v2790_v9 }
  0x32   : > { %2291 = vmatprep.mubr.msk.f32.mxu1 %vm2609_vm1, %v2610_v7 }
 0x104   : > { %v2797_v10 = vpop.f32.mrb[0].mxu1 }
 0x105   : > { %499 = vrot.lane.b32.xlu1 %v2797_v10, %s2611_s0  ;;  %493 = vrot.lane.b32.xlu0 %v2797_v10, %s2612_s24  ;;  %v2288_v11 = vpop.f32.mrb[1].mxu1  ;;  %s3000_s0 = scalar_lea.hbm %s3066_s7, %s2231_s21  ;;  %s2032_s24 = scalar_lea.sflag [#allocation4], %s3091_s28 }
 0x109   : > { %502 = vrot.lane.b32.xlu1 %v2797_v10, %s2613_s26  ;;  %496 = vrot.lane.b32.xlu0 %v2797_v10, %s2614_s27  ;;  %s2627_s27 = smov [#allocation3]  }
 0x10d   : > { %487 = vrot.lane.b32.xlu1 %v2797_v10, %s2615_s8  ;;  %484 = vrot.lane.b32.xlu0 %v2797_v10, %s2616_s17  ;;  %s2516_s8 = sshll.u32 %s2627_s27, 4  ;;  %s2517_s8 = int_to_ptr.vmem [resolvable:$false] %s2516_s8 }
 0x10e   : > { %s2518_s17 = scalar_lea.vmem %s2517_s8, 256 }
 0x111   : > { %490 = vrot.lane.b32.xlu0 %v2797_v10, %s2617_s18 }
 0x177   : > { %v500_v19 = vpop.permute.xlu1 %499  ;;  %v494_v20 = vpop.permute.xlu0 %493 }
 0x178   : > { %v549_v23 = vcombine.low %v494_v20, %v500_v19  ;;  %v550_v24 = vcombine.high %v494_v20, %v500_v19 }
 0x17a   : > { %v557_v30 = vrot.slane %v549_v23, %v2809_v22  ;;  %v564_v31 = vrot.slane %v550_v24, %v2809_v22 }
 0x17b   : > { %v503_v25 = vpop.permute.xlu1 %502  ;;  %v497_v26 = vpop.permute.xlu0 %496 }
 0x17c   : > { %v565_v27 = vcombine.low %v497_v26, %v503_v25  ;;  %v566_v28 = vcombine.high %v497_v26, %v503_v25 }
 0x17e   : > { %v573_v32 = vrot.slane %v565_v27, %v2809_v22  ;;  %v580_v33 = vrot.slane %v566_v28, %v2809_v22 }
 0x17f   : > { %v485_v34 = vpop.permute.xlu0 %484  ;;  %v488_v39 = vpop.permute.xlu1 %487 }
 0x180   : > { %v613_v35 = vcombine.low %v557_v30, %v573_v32  ;;  %v614_v36 = vcombine.high %v557_v30, %v573_v32  ;;  %v629_v37 = vcombine.low %v564_v31, %v580_v33  ;;  %v630_v38 = vcombine.high %v564_v31, %v580_v33 }
 0x181   : > { %v517_v44 = vcombine.low %v2797_v10, %v488_v39  ;;  %v518_v45 = vcombine.high %v2797_v10, %v488_v39 }
 0x182   : > { %v621_v40 = vrot.slane %v613_v35, %v2812_v29  ;;  %v628_v41 = vrot.slane %v614_v36, %v2812_v29  ;;  %v637_v42 = vrot.slane %v629_v37, %v2812_v29  ;;  %v644_v43 = vrot.slane %v630_v38, %v2812_v29 }
 0x183   : > { %v491_v46 = vpop.permute.xlu0 %490  ;;  %v525_v57 = vrot.slane %v517_v44, %v2809_v22  ;;  %v532_v58 = vrot.slane %v518_v45, %v2809_v22 }
 0x184   : > { %v2203_v47 = vcombine.low %v621_v40, %v628_v41  ;;  %v2205_v48 = vcombine.high %v621_v40, %v628_v41  ;;  %v2207_v49 = vcombine.low %v637_v42, %v644_v43  ;;  %v2209_v50 = vcombine.high %v637_v42, %v644_v43 }
 0x185   : > { %v533_v51 = vcombine.low %v485_v34, %v491_v46  ;;  %v534_v52 = vcombine.high %v485_v34, %v491_v46 }
 0x186   : > { %v736_v53 = vrot.slane %v2203_v47, %v2809_v22  ;;  %v752_v54 = vrot.slane %v2205_v48, %v2809_v22  ;;  %v768_v55 = vrot.slane %v2207_v49, %v2809_v22  ;;  %v784_v56 = vrot.slane %v2209_v50, %v2809_v22 }
 0x187   : > { %v541_v59 = vrot.slane %v533_v51, %v2809_v22  ;;  %v548_v60 = vrot.slane %v534_v52, %v2809_v22 }
 0x188   : > { %v801_v61 = vcombine.low %v736_v53, %v752_v54  ;;  %v833_v62 = vcombine.low %v768_v55, %v784_v56  ;;  %v802_v63 = vcombine.high %v736_v53, %v752_v54  ;;  %v834_v0 = vcombine.high %v768_v55, %v784_v56 }
 0x189   : > { %v581_v1 = vcombine.low %v525_v57, %v541_v59  ;;  %v582_v2 = vcombine.high %v525_v57, %v541_v59  ;;  %v597_v3 = vcombine.low %v532_v58, %v548_v60  ;;  %v598_v5 = vcombine.high %v532_v58, %v548_v60 }
 0x18a   : > { %v809_v6 = vrot.slane %v801_v61, %v2812_v29  ;;  %v841_v8 = vrot.slane %v833_v62, %v2812_v29  ;;  %v816_v11 = vrot.slane %v802_v63, %v2812_v29  ;;  %v848_v12 = vrot.slane %v834_v0, %v2812_v29 }
 0x18b   : > { %v589_v13 = vrot.slane %v581_v1, %v2812_v29  ;;  %v596_v14 = vrot.slane %v582_v2, %v2812_v29  ;;  %v605_v15 = vrot.slane %v597_v3, %v2812_v29  ;;  %v612_v16 = vrot.slane %v598_v5, %v2812_v29 }
 0x18c   : > { %v853_v17 = vcombine.low %v809_v6, %v841_v8  ;;  %v855_v19 = vcombine.low %v816_v11, %v848_v12  ;;  %v854_v40 = vcombine.high %v809_v6, %v841_v8  ;;  %v856_v42 = vcombine.high %v816_v11, %v848_v12 }
 0x18d   : > { %v2202_v20 = vcombine.low %v589_v13, %v596_v14  ;;  %v2204_v21 = vcombine.high %v589_v13, %v596_v14  ;;  %v2206_v23 = vcombine.low %v605_v15, %v612_v16  ;;  %v2208_v24 = vcombine.high %v605_v15, %v612_v16 }
 0x18e   : > { %2290 = vmatpush3.xpose.msk.msra.mxu1 %vm925_vm3, %v853_v17  ;;  %2300 = vmatpush3.xpose.msk.msra.mxu0 %vm925_vm3, %v855_v19 }
 0x18f   : > { %v729_v25 = vrot.slane %v2202_v20, %v2809_v22  ;;  %v745_v26 = vrot.slane %v2204_v21, %v2809_v22  ;;  %v761_v27 = vrot.slane %v2206_v23, %v2809_v22  ;;  %v777_v28 = vrot.slane %v2208_v24, %v2809_v22  ;;  %2294 = vmatprep.subr.mxu1 %v2610_v7 }
 0x190   : > { %2309 = vmatprep.subr.mxu0 %v2610_v7 }
 0x191   : > { %v785_v30 = vcombine.low %v729_v25, %v745_v26  ;;  %v817_v31 = vcombine.low %v761_v27, %v777_v28  ;;  %v786_v32 = vcombine.high %v729_v25, %v745_v26  ;;  %v818_v33 = vcombine.high %v761_v27, %v777_v28 }
 0x193   : > { %v793_v34 = vrot.slane %v785_v30, %v2812_v29  ;;  %v825_v35 = vrot.slane %v817_v31, %v2812_v29  ;;  %v800_v36 = vrot.slane %v786_v32, %v2812_v29  ;;  %v832_v37 = vrot.slane %v818_v33, %v2812_v29 }
 0x195   : > { %v849_v38 = vcombine.low %v793_v34, %v825_v35  ;;  %v851_v39 = vcombine.low %v800_v36, %v832_v37  ;;  %v850_v41 = vcombine.high %v793_v34, %v825_v35  ;;  %v852_v43 = vcombine.high %v800_v36, %v832_v37 }
 0x197   : > { %2292 = vmatmul.mubr.msk.f32.vlgmr.msra.gmra.mrb[2].mxu1 %vm925_vm3, %v849_v38  ;;  %2302 = vmatmul.mubr.msk.f32.vlgmr.msra.gmra.mrb[0].mxu0 %vm925_vm3, %v851_v39 }
 0x198   : > { %2295 = vmatpush3.xpose.msk.msra.mxu1 %vm925_vm3, %v854_v40  ;;  %2296 = vmatprep.mubr.msk.f32.mxu1 %vm2609_vm1, %v2610_v7 }
 0x199   : > { %2304 = vmatprep.subr.mxu1 %v2610_v7  ;;  %2311 = vmatprep.mubr.msk.f32.mxu0 %vm2609_vm1, %v2610_v7 }
 0x19b   : > { %2297 = vmatmul.mubr.msk.f32.vlgmr.msra.gmra.mrb[4].mxu1 %vm925_vm3, %v850_v41 }
 0x19c   : > { %2305 = vmatpush3.xpose.msk.msra.mxu1 %vm925_vm3, %v856_v42  ;;  %2306 = vmatprep.mubr.msk.f32.mxu1 %vm2609_vm1, %v2610_v7 }
 0x19d   : > { %2314 = vmatprep.subr.mxu1 %v2610_v7 }
 0x19f   : > { %2307 = vmatmul.mubr.msk.f32.vlgmr.msra.gmra.mrb[6].mxu1 %vm925_vm3, %v852_v43 }
 0x1a0   : > { %2316 = vmatprep.mubr.msk.f32.mxu1 %vm2609_vm1, %v2610_v7 }
 0x26a   : > { %v998_v44 = vpop.f32.mrb[2].mxu1  ;;  %v1150_v45 = vpop.f32.mrb[0].mxu0 }
 0x26b   : > { %v1230_v46 = vmul.f32 2.828427, %v998_v44  ;;  %v2293_v47 = vpop.f32.mrb[3].mxu1  ;;  %v2303_v48 = vpop.f32.mrb[1].mxu0  ;;  %v1232_v53 = vmul.f32 2.828427, %v1150_v45 }
 0x26d   : > { %v1234_v49 = vsel %vm925_vm3, %v1230_v46, -inf  ;;  %v1240_v58 = vsel %vm925_vm3, %v1232_v53, -inf }
 0x26e   : > { %1235 = vmax.xlane.f32.xlu1 %v1234_v49  ;;  %v1074_v50 = vpop.f32.mrb[4].mxu1 }
 0x26f   : > { %v1231_v51 = vmul.f32 2.828427, %v1074_v50  ;;  %v2298_v52 = vpop.f32.mrb[5].mxu1 }
 0x271   : > { %v1237_v54 = vsel %vm925_vm3, %v1231_v51, -inf }
 0x272   : > { %1238 = vmax.xlane.f32.xlu0 %v1237_v54  ;;  %v1226_v55 = vpop.f32.mrb[6].mxu1 }
 0x273   : > { %v1233_v56 = vmul.f32 2.828427, %v1226_v55  ;;  %v2308_v57 = vpop.f32.mrb[7].mxu1 }
 0x275   : > { %v1243_v59 = vsel %vm925_vm3, %v1233_v56, -inf }
 0x276   : > { %1241 = vmax.xlane.f32.xlu0 %v1240_v58  ;;  %1244 = vmax.xlane.f32.xlu1 %v1243_v59 }
 0x287   : > { %508 = vrot.lane.b32.xlu1 %v2797_v10, %s2620_s10 }
 0x28c   : > { %505 = vrot.lane.b32.xlu0 %v2797_v10, %s2621_s15 }
 0x2fb   : > { %v1236_v60 = vpop.xlane.xlu1 %1235 }
 0x2fc   : > { %v1246_v61 = vsub.f32 %v1230_v46, %v1236_v60 }
 0x2fe   : > { %v1250_v62 = vmul.f32 1.442695, %v1246_v61 }
 0x2ff   : > { %v1239_v63 = vpop.xlane.xlu0 %1238 }
 0x300   : > { %2490 = vpow2.f32 %v1250_v62  ;;  %v1247_v0 = vsub.f32 %v1231_v51, %v1239_v63 }
 0x302   : > { %v1252_v1 = vmul.f32 1.442695, %v1247_v0 }
 0x303   : > { %v1242_v2 = vpop.xlane.xlu0 %1241  ;;  %v1245_v3 = vpop.xlane.xlu1 %1244 }
 0x304   : > { %2492 = vpow2.f32 %v1252_v1  ;;  %v1248_v5 = vsub.f32 %v1232_v53, %v1242_v2  ;;  %v1249_v6 = vsub.f32 %v1233_v56, %v1245_v3 }
 0x306   : > { %v1254_v8 = vmul.f32 1.442695, %v1248_v5  ;;  %v1256_v11 = vmul.f32 1.442695, %v1249_v6 }
 0x307   : > { %v506_v21 = vpop.permute.xlu0 %505  ;;  %v509_v23 = vpop.permute.xlu1 %508 }
 0x308   : > { %2494 = vpow2.f32 %v1254_v8 }
 0x309   : > { %2496 = vpow2.f32 %v1256_v11 }
 0x30a   : > { %v2874_v12 = vpop.eup %2490 }
 0x30b   : > { %v1258_v13 = vsel %vm925_vm3, %v2874_v12, 0.0 }
 0x30c   : > { %1259 = vadd.xlane.f32.xlu0 %v1258_v13 }
 0x30e   : > { %v2878_v14 = vpop.eup %2492 }
 0x30f   : > { %v1261_v15 = vsel %vm925_vm3, %v2878_v14, 0.0 }
 0x310   : > { %1262 = vadd.xlane.f32.xlu1 %v1261_v15  ;;  %v1724_v15 = vld [vmem:[%s2758_s29 + $0x8] sm:$0xff] }
 0x312   : > { %v2882_v16 = vpop.eup %2494 }
 0x313   : > { %v2884_v17 = vpop.eup %2496  ;;  %v1264_v19 = vsel %vm925_vm3, %v2882_v16, 0.0 }
 0x314   : > { %1265 = vadd.xlane.f32.xlu0 %v1264_v19  ;;  %v1267_v20 = vsel %vm925_vm3, %v2884_v17, 0.0 }
 0x315   : > { %1268 = vadd.xlane.f32.xlu1 %v1267_v20 }
 0x326   : > { %511 = vrot.lane.b32.xlu1 %v2797_v10, %s2622_s20 }
 0x32a   : > { %514 = vrot.lane.b32.xlu0 %v2797_v10, %s2623_s22 }
 0x399   : > { %v1260_v24 = vpop.xlane.xlu0 %1259 }
 0x39a   : > { %2498 = vrcp.f32 %v1260_v24 }
 0x39d   : > { %v1263_v25 = vpop.xlane.xlu1 %1262 }
 0x39e   : > { %2500 = vrcp.f32 %v1263_v25 }
 0x3a1   : > { %v1266_v26 = vpop.xlane.xlu0 %1265 }
 0x3a2   : > { %v1269_v27 = vpop.xlane.xlu1 %1268  ;;  %2502 = vrcp.f32 %v1266_v26 }
 0x3a3   : > { %2504 = vrcp.f32 %v1269_v27 }
 0x3a4   : > { %v2499_v56 = vpop.eup %2498 }
 0x3a5   : > { %v515_v28 = vpop.permute.xlu0 %514  ;;  %v1271_v3 = vmul.f32 %v2499_v56, %v2874_v12 }
 0x3a6   : > { %v669_v30 = vcombine.low %v509_v23, %v515_v28  ;;  %v670_v31 = vcombine.high %v509_v23, %v515_v28  ;;  %v512_v32 = vpop.permute.xlu1 %511 }
 0x3a7   : > { %v653_v33 = vcombine.low %v506_v21, %v512_v32  ;;  %v654_v34 = vcombine.high %v506_v21, %v512_v32 }
 0x3a8   : > { %v677_v35 = vrot.slane %v669_v30, %v2809_v22  ;;  %v684_v36 = vrot.slane %v670_v31, %v2809_v22  ;;  %v2501_v60 = vpop.eup %2500 }
 0x3a9   : > { %v661_v37 = vrot.slane %v653_v33, %v2809_v22  ;;  %v668_v10 = vrot.slane %v654_v34, %v2809_v22  ;;  %v1273_v5 = vmul.f32 %v2501_v60, %v2878_v14  ;;  %v1723_v14 = vld [vmem:[%s2758_s29] sm:$0xff] }
 0x3ab   : > { %v685_v38 = vcombine.low %v661_v37, %v677_v35  ;;  %v686_v39 = vcombine.high %v661_v37, %v677_v35  ;;  %v701_v40 = vcombine.low %v668_v10, %v684_v36  ;;  %v702_v41 = vcombine.high %v668_v10, %v684_v36 }
 0x3ac   : > { %v2503_v2 = vpop.eup %2502 }
 0x3ad   : > { %v693_v42 = vrot.slane %v685_v38, %v2812_v29  ;;  %v700_v43 = vrot.slane %v686_v39, %v2812_v29  ;;  %v709_v44 = vrot.slane %v701_v40, %v2812_v29  ;;  %v716_v45 = vrot.slane %v702_v41, %v2812_v29  ;;  %v2505_v6 = vpop.eup %2504  ;;  %v1725_v39 = vld [vmem:[%s2758_s29 + $0x10] sm:$0xff]  ;;  %v1726_v40 = vld [vmem:[%s2758_s29 + $0x18] sm:$0xff]  ;;  %s2624_s29 = smov 16  }
 0x3ae   : > { %v1275_v13 = vmul.f32 %v2503_v2, %v2882_v16  ;;  %v1277_v12 = vmul.f32 %v2505_v6, %v2884_v17  ;;  %v2377_v16 = vpack.c.bf16 %v1724_v15, %v1723_v14 }
 0x3af   : > { %v857_v46 = vcombine.low %v693_v42, %v700_v43  ;;  %v2210_v47 = vcombine.high %v693_v42, %v700_v43  ;;  %v873_v48 = vcombine.low %v709_v44, %v716_v45  ;;  %v2211_v49 = vcombine.high %v709_v44, %v716_v45 }
 0x3b0   : > { %v2380_v45 = vpack.c.bf16 %v1726_v40, %v1725_v39  ;;  %v1921_v40 = vld [vmem:[%s2774_s12 + $0x10] sm:$0xff] }
 0x3b1   : > { %v864_v50 = vrot.slane %v857_v46, %v2809_v22  ;;  %v872_v51 = vrot.slane %v2210_v47, %v2809_v22  ;;  %v880_v52 = vrot.slane %v873_v48, %v2809_v22  ;;  %v888_v53 = vrot.slane %v2211_v49, %v2809_v22 }
 0x3b3   : > { %v889_v54 = vcombine.low %v864_v50, %v872_v51  ;;  %v890_v55 = vcombine.high %v864_v50, %v872_v51  ;;  %v905_v57 = vcombine.low %v880_v52, %v888_v53  ;;  %v906_v58 = vcombine.high %v880_v52, %v888_v53 }
 0x3b5   : > { %v897_v59 = vrot.slane %v889_v54, %v2812_v29  ;;  %v913_v61 = vrot.slane %v905_v57, %v2812_v29  ;;  %v904_v62 = vrot.slane %v890_v55, %v2812_v29  ;;  %v920_v63 = vrot.slane %v906_v58, %v2812_v29 }
 0x3b7   : > { %v921_v0 = vcombine.low %v897_v59, %v913_v61  ;;  %v922_v1 = vcombine.high %v897_v59, %v913_v61  ;;  %v923_v8 = vcombine.low %v904_v62, %v920_v63  ;;  %v924_v11 = vcombine.high %v904_v62, %v920_v63 }
 0x3b9   : > { %2310 = vmatpush3.msra.mxu0 %v921_v0  ;;  %2315 = vmatpush3.msra.mxu1 %v922_v1 }
 0x3ba   : > { %2312 = vmatmul.mubr.msk.f32.vlgmr.msra.gmra.mrb[2].mxu0 %vm925_vm3, %v1271_v3  ;;  %2317 = vmatmul.mubr.msk.f32.vlgmr.msra.gmra.mrb[8].mxu1 %vm925_vm3, %v1273_v5 }
 0x3bb   : > { %2319 = vmatprep.subr.mxu0 %v2610_v7  ;;  %2324 = vmatprep.subr.mxu1 %v2610_v7 }
 0x3bc   : > { %2320 = vmatpush3.msra.mxu0 %v923_v8  ;;  %2325 = vmatpush3.msra.mxu1 %v924_v11 }
 0x3bd   : > { %2321 = vmatprep.mubr.msk.f32.mxu0 %vm2609_vm1, %v2610_v7  ;;  %2326 = vmatprep.mubr.msk.f32.mxu1 %vm2609_vm1, %v2610_v7 }
 0x3be   : > { %2322 = vmatmul.mubr.msk.f32.vlgmr.msra.gmra.mrb[4].mxu0 %vm925_vm3, %v1275_v13  ;;  %2327 = vmatmul.mubr.msk.f32.vlgmr.msra.gmra.mrb[10].mxu1 %vm925_vm3, %v1277_v12 }
 0x3bf   : > { %2376 = vmatprep.subr.bf16.mxu0 %v2608_v4  ;;  %2337 = vmatprep.mubr.msk.f32.mxu0 %vm2609_vm1, %v2610_v7 }
 0x3c0   : > { %2382 = vmatprep.subr.bf16.mxu1 %v2608_v4  ;;  %2348 = vmatprep.mubr.msk.f32.mxu1 %vm2609_vm1, %v2610_v7 }
 0x3c1   : > { %2378 = vmatpush3.bf16.msra.mxu0 %v2377_v16 }
 0x3c2   : > { %2379 = vmatprep.subr.bf16.mxu0 %v2608_v4 }
 0x3c5   : > { %2381 = vmatpush3.bf16.msra.mxu0 %v2380_v45 }
 0x3c6   : > { %2388 = vmatprep.subr.bf16.mxu0 %v2608_v4 }
 0x48d   : > { %v1347_v17 = vpop.f32.mrb[2].mxu0  ;;  %v1420_v19 = vpop.f32.mrb[8].mxu1 }
 0x48e   : > { %v2313_v20 = vpop.f32.mrb[3].mxu0  ;;  %v2318_v21 = vpop.f32.mrb[9].mxu1 }
 0x48f   : > { %v1826_v20 = vld [vmem:[%s2763_s14] sm:$0xff]  ;;  %v1827_v21 = vld [vmem:[%s2763_s14 + $0x8] sm:$0xff] }
 0x491   : > { %v1493_v23 = vpop.f32.mrb[4].mxu0  ;;  %v1566_v24 = vpop.f32.mrb[10].mxu1 }
 0x492   : > { %v1570_v25 = vcombine.low %v1347_v17, %v1493_v23  ;;  %v1571_v26 = vcombine.high %v1347_v17, %v1493_v23  ;;  %v1586_v27 = vcombine.low %v1420_v19, %v1566_v24  ;;  %v1587_v28 = vcombine.high %v1420_v19, %v1566_v24  ;;  %v2323_v30 = vpop.f32.mrb[5].mxu0  ;;  %v2328_v31 = vpop.f32.mrb[11].mxu1  ;;  %v1829_v23 = vld [vmem:[%s2763_s14 + $0x18] sm:$0xff] }
 0x493   : > { %v2964_v30 = vld [vmem:[%s2779_s11] sm:$0x1f]  ;;  %v1823_v31 = vsub.s32 1, %v2806_v18 }
 0x494   : > { %v1578_v32 = vrot.slane %v1570_v25, %v2809_v22  ;;  %v1585_v33 = vrot.slane %v1571_v26, %v2809_v22  ;;  %v1594_v34 = vrot.slane %v1586_v27, %v2809_v22  ;;  %v1601_v35 = vrot.slane %v1587_v28, %v2809_v22 }
 0x495   : > { %v1818_v28 = vsub.s32 0, %v2806_v18 }
 0x496   : > { %v1602_v36 = vcombine.low %v1578_v32, %v1594_v34  ;;  %v1603_v37 = vcombine.high %v1578_v32, %v1594_v34  ;;  %v1618_v10 = vcombine.low %v1585_v33, %v1601_v35  ;;  %v1619_v38 = vcombine.high %v1585_v33, %v1601_v35 }
 0x497   : > { %v1819_v32 = vrot.slane %v2964_v30, %v1818_v28  ;;  %v1824_v35 = vrot.slane %v2964_v30, %v1823_v31 }
 0x498   : > { %v1610_v41 = vrot.slane %v1602_v36, %v2812_v29  ;;  %v1617_v42 = vrot.slane %v1603_v37, %v2812_v29  ;;  %v1626_v43 = vrot.slane %v1618_v10, %v2812_v29  ;;  %v1633_v44 = vrot.slane %v1619_v38, %v2812_v29  ;;  %v1919_v10 = vld [vmem:[%s2774_s12] sm:$0xff]  ;;  %v1920_v38 = vld [vmem:[%s2774_s12 + $0x8] sm:$0xff] }
 0x499   : > { %v2389_v39 = vpack.c.bf16 %v1920_v38, %v1919_v10 }
 0x49a   : > { %v1638_v46 = vcombine.low %v1610_v41, %v1617_v42  ;;  %v2224_v47 = vcombine.high %v1610_v41, %v1617_v42  ;;  %v1654_v48 = vcombine.low %v1626_v43, %v1633_v44  ;;  %v2225_v49 = vcombine.high %v1626_v43, %v1633_v44  ;;  %v1922_v41 = vld [vmem:[%s2774_s12 + $0x18] sm:$0xff]  ;;  %v1923_v43 = vld [vmem:[%s2774_s12 + $0x20] sm:$0xff]  ;;  %v1924_v44 = vld [vmem:[%s2774_s12 + $0x28] sm:$0xff] }
 0x49b   : > { %v2392_v42 = vpack.c.bf16 %v1922_v41, %v1921_v40  ;;  %v2395_v45 = vpack.c.bf16 %v1924_v44, %v1923_v43 }
 0x49c   : > { %v1645_v50 = vrot.slane %v1638_v46, %v2809_v22  ;;  %v1653_v51 = vrot.slane %v2224_v47, %v2809_v22  ;;  %v1661_v52 = vrot.slane %v1654_v48, %v2809_v22  ;;  %v1669_v53 = vrot.slane %v2225_v49, %v2809_v22  ;;  %v1925_v46 = vld [vmem:[%s2774_s12 + $0x30] sm:$0xff]  ;;  %v1926_v47 = vld [vmem:[%s2774_s12 + $0x38] sm:$0xff]  ;;  %v2227_v49 = vld [vmem:[%s387_s23] ss:$0 sm:$0xff]  ;;  %s2045_s23 = sshll.u32 %s365_s1, 4  ;;  %s3002_s23 = int_to_ptr.vmem [resolvable:$true] %s2045_s23 }
 0x49d   : > { %v2398_v48 = vpack.c.bf16 %v1926_v47, %v1925_v46  ;;  %s2512_s26 = scalar_lea.vmem %s3002_s23, 128  ;;  %p2519_p5 = scmp.lt.s32.totalorder %s3002_s23, %s2517_s8 }
 0x49e   : > { %v1671_v54 = vcombine.high %v1645_v50, %v1653_v51  ;;  %v1687_v55 = vcombine.high %v1661_v52, %v1669_v53  ;;  %v1670_v56 = vcombine.low %v1645_v50, %v1653_v51  ;;  %v1686_v57 = vcombine.low %v1661_v52, %v1669_v53  ;;  %p2513_p1 = scmp.ne.s32.totalorder %s3002_s23, %s2512_s26  ;;  %p2520_p6 = scmp.lt.s32.totalorder %s2518_s17, %s2512_s26 }
 0x4a0   : > { %v1685_v58 = vrot.slane %v1671_v54, %v2812_v29  ;;  %v1701_v59 = vrot.slane %v1687_v55, %v2812_v29  ;;  %v1678_v60 = vrot.slane %v1670_v56, %v2812_v29  ;;  %v1694_v61 = vrot.slane %v1686_v57, %v2812_v29  ;;  %p2514_p2 = pnand %p2513_p1, %p2717_p3  ;;  %p2521_p7 = por %p2520_p6, %p2519_p5 }
 0x4a2   : > { %v1704_v62 = vcombine.low %v1685_v58, %v1701_v59  ;;  %v1703_v63 = vcombine.high %v1678_v60, %v1694_v61  ;;  %v1705_v0 = vcombine.high %v1685_v58, %v1701_v59  ;;  %v1702_v1 = vcombine.low %v1678_v60, %v1694_v61  ;;  %p2515_p4 = pneg %p2514_p2 }
 0x4a3   : > { %v1929_v61 = vsub.s32 2, %v2806_v18 }
 0x4a4   : > { %1711 = vrot.lane.b32.xlu0 %v1704_v62, %s2624_s29  ;;  %1707 = vrot.lane.b32.xlu1 %v1703_v63, %s2625_s9  ;;  %p2522_p8 = pnand %p2521_p7, %p2515_p4 }
 0x4a5   : > { %v1930_v62 = vrot.slane %v2964_v30, %v1929_v61 }
 0x4a8   : > { %1715 = vrot.lane.b32.xlu1 %v1705_v0, %s2626_s16 }
 0x516   : > { %v1708_v22 = vpop.permute.xlu1 %1707  ;;  %v1712_v2 = vpop.permute.xlu0 %1711 }
 0x517   : > { %v1718_v3 = vsel %vm925_vm3, %v1702_v1, %v1708_v22 }
 0x518   : > { %v1720_v6 = vsel %vm1719_vm4, %v1718_v3, %v1712_v2 }
 0x51a   : > { %v1716_v5 = vpop.permute.xlu1 %1715 }
 0x51b   : > { %v1722_v29 = vsel %vm1721_vm5, %v1720_v6, %v1716_v5 }
 0x51c   : > { %2338 = vmatmul.mubr.msk.f32.vlgmr.msra.gmra.mrb[6].mxu0 %vm409_vm2, %v1722_v29 }
 0x51d   : > { %2367 = vmatprep.mubr.msk.f32.mxu0 %vm2609_vm1, %v2610_v7  ;;  %v2383_v7 = vpack.c.bf16 %v1827_v21, %v1826_v20  ;;  %2390 = vmatpush3.bf16.msra.mxu0 %v2389_v39 }
 0x51e   : > { %2391 = vmatprep.subr.bf16.mxu0 %v2608_v4 }
 0x51f   : > { %2384 = vmatpush3.bf16.msra.mxu1 %v2383_v7 }
 0x520   : > { %2385 = vmatprep.subr.bf16.mxu1 %v2608_v4 }
 0x521   : > { %2393 = vmatpush3.bf16.msra.mxu0 %v2392_v42 }
 0x522   : > { %2394 = vmatprep.subr.bf16.mxu0 %v2608_v4 }
 0x525   : > { %2396 = vmatpush3.bf16.msra.mxu0 %v2395_v45 }
 0x526   : > { %2397 = vmatprep.subr.bf16.mxu0 %v2608_v4 }
 0x529   : > { %2399 = vmatpush3.bf16.msra.mxu0 %v2398_v48 }
 0x5ef   : > { %v1796_v8 = vpop.f32.mrb[6].mxu0 }
 0x5f0   : > { %v1801_v11 = vadd.f32 %v1796_v8, %v2790_v9  ;;  %v2339_v13 = vpop.f32.mrb[7].mxu0  ;;  %v1828_v9 = vld [vmem:[%s2763_s14 + $0x10] sm:$0xff] }
 0x5f1   : > { %v2386_v24 = vpack.c.bf16 %v1829_v23, %v1828_v9 }
 0x5f2   : > { %v1802_v12 = vsel %vm409_vm2, %v1801_v11, 0.0 }
 0x5f3   : > { %1803 = vadd.xlane.f32.xlu0 %v1802_v12  ;;  %2387 = vmatpush3.bf16.msra.mxu1 %v2386_v24 }
 0x680   : > { %v1804_v14 = vpop.xlane.xlu0 %1803 }
 0x681   : > { %v1806_v15 = vmul.f32 0.03125, %v1804_v14  ;;  %v2021_v14 = vsub.s32 3, %v2806_v18 }
 0x683   : > { %v1807_v16 = vsub.f32 %v1801_v11, %v1806_v15  ;;  %v2026_v15 = vsub.s32 4, %v2806_v18 }
 0x685   : > { %v1808_v17 = vmul.f32 %v1807_v16, %v1807_v16  ;;  %v2027_v20 = vrot.slane %v2964_v30, %v2026_v15 }
 0x687   : > { %v1809_v19 = vsel %vm409_vm2, %v1808_v17, 0.0 }
 0x688   : > { %1810 = vadd.xlane.f32.xlu1 %v1809_v19 }
 0x715   : > { %v1811_v25 = vpop.xlane.xlu1 %1810 }
 0x716   : > { %v1812_v26 = vmul.f32 0.03125, %v1811_v25 }
 0x718   : > { %v1813_v27 = vadd.f32 1e-05, %v1812_v26 }
 0x71a   : > { %2506 = vrsqrt.f32 %v1813_v27 }
 0x724   : > { %v2507_v33 = vpop.eup %2506 }
 0x725   : > { %v1815_v34 = vmul.f32 %v2507_v33, %v1807_v16  ;;  %v2022_v16 = vrot.slane %v2964_v30, %v2021_v14 }
 0x727   : > { %v1820_v36 = vmul.f32 %v1819_v32, %v1815_v34 }
 0x729   : > { %v1825_v37 = vadd.f32 %v1824_v35, %v1820_v36 }
 0x72b   : > { %2349 = vmatmul.mubr.msk.f32.vlgmr.msra.gmra.mrb[12].mxu1 %vm409_vm2, %v1825_v37 }
 0x7fe   : > { %v1906_v50 = vpop.f32.mrb[12].mxu1 }
 0x7ff   : > { %v1907_v51 = vadd.f32 %v2227_v49, %v1906_v50  ;;  %v2350_v52 = vpop.f32.mrb[13].mxu1 }
 0x801   : > { %v1910_v53 = vmul.f32 %v1907_v51, %v1907_v51 }
 0x803   : > { %v1911_v54 = vmul.f32 %v1910_v53, %v1907_v51 }
 0x805   : > { %v1912_v55 = vmul.f32 0.044715, %v1911_v54 }
 0x807   : > { %v1913_v56 = vadd.f32 %v1912_v55, %v1907_v51 }
 0x809   : > { %v1914_v57 = vmul.f32 0.7978846, %v1913_v56 }
 0x80b   : > { %2508 = vtanh.f32 %v1914_v57 }
 0x815   : > { %v2509_v58 = vpop.eup %2508 }
 0x816   : > { %v1916_v4 = vadd.f32 1.0, %v2509_v58 }
 0x818   : > { %v1917_v59 = vmul.f32 0.5, %v1916_v4 }
 0x81a   : > { %v1918_v60 = vmul.f32 %v1917_v59, %v1907_v51 }
 0x81c   : > { %2368 = vmatmul.mubr.msk.f32.vlgmr.msra.gmra.mrb[8].mxu0 %vm1931_vm6, %v1918_v60 }
 0x8ef   : > { %v2001_v63 = vpop.f32.mrb[8].mxu0 }
 0x8f0   : > { %v2002_v0 = vadd.f32 %v2001_v63, %v1930_v62  ;;  %v2369_v1 = vpop.f32.mrb[9].mxu0 }
 0x8f2   : > { %v2005_v22 = vadd.f32 %v2002_v0, %v1825_v37 }
 0x8f4   : > { %v2006_v2 = vsel %vm409_vm2, %v2005_v22, 0.0 }
 0x8f5   : > { %2007 = vadd.xlane.f32.xlu0 %v2006_v2 }
 0x982   : > { %v2008_v3 = vpop.xlane.xlu0 %2007 }
 0x983   : > { %v2009_v5 = vmul.f32 0.03125, %v2008_v3 }
 0x985   : > { %v2010_v6 = vsub.f32 %v2005_v22, %v2009_v5 }
 0x987   : > { %v2011_v29 = vmul.f32 %v2010_v6, %v2010_v6 }
 0x989   : > { %v2012_v8 = vsel %vm409_vm2, %v2011_v29, 0.0 }
 0x98a   : > { %2013 = vadd.xlane.f32.xlu0 %v2012_v8 }
 0xa17   : > { %v2014_v11 = vpop.xlane.xlu0 %2013 }
 0xa18   : > { %v2015_v13 = vmul.f32 0.03125, %v2014_v11 }
 0xa1a   : > { %v2016_v12 = vadd.f32 1e-05, %v2015_v13 }
 0xa1c   : > { %2510 = vrsqrt.f32 %v2016_v12 }
 0xa26   : > { %v2511_v17 = vpop.eup %2510 }
 0xa27   : > { %v2018_v19 = vmul.f32 %v2511_v17, %v2010_v6 }
 0xa29   : > { %v2023_v21 = vmul.f32 %v2022_v16, %v2018_v19 }
 0xa2b   : > { %v2028_v7 = vadd.f32 %v2027_v20, %v2023_v21 }
 0xa2d   : > { %2029 = vst.msk [vmem:[#allocation2] sm:$0xff] %vm409_vm2, %v2028_v7  ;;  %2030 = vst.msk [vmem:[%s365_s1] sm:$0xff] %vm409_vm2, %v2028_v7 }
 0xa2e   : > { %2525 = shalt.err (!%p2522_p8)
}
 0xa2f   : > { %s2526_s1 = scalar_lea.hbm %s3000_s0, 128  ;;  %s2530_s10 = scalar_lea.hbm %s3066_s7, 256 }
 0xa30   : > { %p2527_p10 = scmp.ne.s32.totalorder %s3000_s0, %s2526_s1  ;;  %p2531_p13 = scmp.lt.u32.totalorder %s3000_s0, %s3066_s7 }
 0xa31   : > { %p2532_p0 = scmp.lt.u32.totalorder %s2530_s10, %s2526_s1  ;;  %p2534_p2 = scmp.lt.u32.totalorder %s2526_s1, %s3000_s0 }
 0xa32   : > { %p2528_p11 = pnand %p2527_p10, %p2717_p3 }
 0xa33   : > { %p2533_p1 = por %p2532_p0, %p2531_p13 }
 0xa34   : > { %p2529_p12 = pneg %p2528_p11 }
 0xa35   : > { %p2535_p4 = por %p2534_p2, %p2533_p1 }
 0xa37   : > { %p2536_p5 = pnand %p2535_p4, %p2529_p12 }
 0xa39   : > { %2539 = shalt.err (!%p2536_p5)
}
 0xa3a   : > { %2400 = dma.vmem_to_hbm [thread:$0]  (%p2717_p3), %s3002_s23, 128, %s3000_s0, %s2032_s24  }
 0xa3b PF: > { %s3092_s22 = sld [smem:[#allocation10_spill]]  ;;  %s3093_s29 = sld [smem:[#allocation6_spill]] }
 0xa41   : > { %p2406_p6 = scmp.ge.s32.totalorder %s3092_s22, 2  ;;  %s2057_s16 = sand.u32 1, %s3093_s29  }
 0xa42   : > { %s2058_s14 = scalar_lea.sflag [#allocation4], %s2057_s16 }
 0xa43   : > { %p2403_p7 = pnand %p2406_p6, %p2727_p9 }
 0xa45   : > { %2573 = dma.done.wait (!%p2403_p7), %s2058_s14, 128  }
 0xa46   : > { %2575 = vsyncadd (!%p2403_p7), %s2058_s14, 4294967168  ;;  %s20_s8 = sadd.s32 1, %s3092_s22   ;;  %s3095_s30 = sld [smem:[#allocation7_spill]] }
 0xa47   : > { %p17_p8 = scmp.ge.s32.totalorder %s20_s8, 8   ;;  %s3096_s26 = sld [smem:[#allocation14_spill]] }
 0xa48   : > { %s3097_s27 = sld [smem:[#allocation8_spill]]  ;;  %s3098_s28 = sld [smem:[#allocation9_spill]] }
 0xa49   : > { %s3099_s29 = sld [smem:[#allocation11_spill]]  ;;  %s3100_s13 = sld [smem:[#allocation12_spill]] }
 0xa4a   : > { %s3101_s24 = smov %s2582_s25  ;;  %19 = sbr.rel (!%p17_p8) target bundleno = 8 (0x8), region = 105 }
 0xa4c   : > { %s3102_s25 = smov %s3095_s30 }
 0xa4f   : > { %s3103_s30 = smov %s3100_s13 }
 0xa51   :  { %2063 = vsyncpa [#allocation4], 1 }
 0xa52   :  { %2065 = vsyncpa [#allocation4 + $0x1], 1 }

</bundles_post_ra>
